<compile_context>
chip_gen: v6e
topology: v6e:2x2x1
jax: 0.10.0
libtpu: 0.0.40
codegen_flags: <defaults>
</compile_context>

<pallas_src>
import functools

import jax
import jax.numpy as jnp
from jax import lax
from jax.experimental import pallas as pl
from jax.experimental.pallas import tpu as pltpu


# contract dim-0 of both operands (i.e. a transposed-lhs matmul); same
# dimension numbers used by the stock TPU flash-attention bwd kernels.
_TN_DIMS = (((0,), (0,)), ((), ()))


def _vmem_spec():
    return pl.BlockSpec(memory_space=pltpu.MemorySpace.VMEM)


# ----------------------------------------------------------------------------
# Kernel 1: fused CACHET.adjust()
#   feat2d[h, b*Cout:(b+1)*Cout] = W^T @ x[b, :, h] + bias   (1x1 conv + permute)
#   pos2d [h, b*Cpos:(b+1)*Cpos] = pos[b, :, h]              (permute only)
# The 2-D (HW, B*C) slabs reshape (free) to the module's (HW, B, C) outputs.
# ----------------------------------------------------------------------------
def _adjust_kernel(x_ref, w_ref, b_ref, pos_ref, feat_ref, posv_ref):
    # x_ref   : (B, Cin,  HW)  NCHW feature map, spatial dims flattened (free reshape)
    # w_ref   : (Cin, Cout)    1x1-conv weight, pre-transposed once at init
    # b_ref   : (1,  Cout)
    # pos_ref : (B, Cpos, HW)
    # feat_ref: (HW, B*Cout)   == feat.flatten(2).permute(2, 0, 1) as a 2-D slab
    # posv_ref: (HW, B*Cpos)   == pos .flatten(2).permute(2, 0, 1) as a 2-D slab
    nb, _, hw = x_ref.shape
    cpos = pos_ref.shape[1]
    cout = w_ref.shape[1]
    w = w_ref[...]
    # hoisted out of the batch loop (JAX does not CSE broadcast/iota)
    bias_full = jnp.broadcast_to(b_ref[...], (hw, cout))
    eye_p = jnp.eye(cpos, dtype=jnp.float32)
    for bi in range(nb):                       # B is tiny & static -> unrolled
        xb = x_ref[bi]                         # (Cin, HW)
        # (HW, Cout) = xb^T @ w as a transposed-lhs matmul: the NHWC flatten
        # never materializes and the result lands directly in feat_vec layout.
        acc = lax.dot_general(xb, w, _TN_DIMS, preferred_element_type=jnp.float32)
        feat_ref[:, bi * cout:(bi + 1) * cout] = (acc + bias_full).astype(feat_ref.dtype)
        # pos permute (Cpos, HW) -> (HW, Cpos), fused here as an identity-RHS
        # transposed matmul: MXU is otherwise idle, and this avoids both a
        # separate XLA transpose (HBM round trip) and a standalone relayout.
        pb = pos_ref[bi]                       # (Cpos, HW)
        pt = lax.dot_general(pb, eye_p, _TN_DIMS, preferred_element_type=jnp.float32)
        posv_ref[:, bi * cpos:(bi + 1) * cpos] = pt.astype(posv_ref.dtype)


def adjust_fused(src_feat, mask, pos_embed, w_t, bias_row):
    """src_feat: (B, Cin, H, W), pos_embed: (B, Cpos, H, W),
    w_t: (Cin, Cout), bias_row: (1, Cout).
    Returns CACHET.adjust()'s dict: feat (HW,B,Cout), mask (B,HW), pos (HW,B,Cpos)."""
    B, Cin, H, W = src_feat.shape
    HW = H * W
    Cout = w_t.shape[1]
    Cpos = pos_embed.shape[1]
    x3 = src_feat.reshape(B, Cin, HW)          # contiguous -> free reshape
    p3 = pos_embed.reshape(B, Cpos, HW)        # contiguous -> free reshape

    feat2d, pos2d = pl.pallas_call(
        _adjust_kernel,
        out_shape=(jax.ShapeDtypeStruct((HW, B * Cout), src_feat.dtype),
                   jax.ShapeDtypeStruct((HW, B * Cpos), pos_embed.dtype)),
        in_specs=[_vmem_spec(), _vmem_spec(), _vmem_spec(), _vmem_spec()],
        out_specs=(_vmem_spec(), _vmem_spec()),
    )(x3, w_t, bias_row, p3)

    feat_vec = feat2d.reshape(HW, B, Cout)     # pure layout glue (contiguous)
    pos_vec = pos2d.reshape(HW, B, Cpos)
    mask_vec = mask.reshape(B, HW)
    return {"feat": feat_vec, "mask": mask_vec, "pos": pos_vec}


# ----------------------------------------------------------------------------
# Kernel 2: apply_uncertain_embed  -- 2-D lane-denser elementwise add
#   pos2d (L, B*C) + emb2d (L, B*C)  (embed pre-broadcast/cached off-path)
# ----------------------------------------------------------------------------
def _add_embed_kernel(pos_ref, emb_ref, o_ref):
    o_ref[...] = pos_ref[...] + emb_ref[...]


def add_uncertain_embed_2d(pos2d, emb2d):
    return pl.pallas_call(
        _add_embed_kernel,
        out_shape=jax.ShapeDtypeStruct(pos2d.shape, pos2d.dtype),
        in_specs=[_vmem_spec(), _vmem_spec()],
        out_specs=_vmem_spec(),
    )(pos2d, emb2d)


# ----------------------------------------------------------------------------
# Kernel 3: mean over the last feat_len_s tokens -> (B, C)
#   Tail is sliced in-kernel (static offset) on the (L, B*C) view; the mean is
#   sum * (1/T) with T a compile-time constant (no divide on the critical path).
# ----------------------------------------------------------------------------
def _mean_tail_kernel(x_ref, o_ref, *, start, length):
    tail = x_ref[pl.ds(start, length), :].astype(jnp.float32)
    o_ref[...] = (jnp.sum(tail, axis=0, keepdims=True) * (1.0 / length)).astype(o_ref.dtype)


def mean_last_tokens(encode_embed, feat_len_s):
    L, B, C = encode_embed.shape
    x2 = encode_embed.reshape(L, B * C)        # contiguous -> free reshape
    out = pl.pallas_call(
        functools.partial(_mean_tail_kernel, start=L - feat_len_s, length=feat_len_s),
        out_shape=jax.ShapeDtypeStruct((1, B * C), jnp.float32),
        in_specs=[_vmem_spec()],
        out_specs=_vmem_spec(),
    )(x2)
    return out.reshape(B, C).astype(encode_embed.dtype)


# ----------------------------------------------------------------------------
# CACHET wrapper (parameters + forward glue)
# ----------------------------------------------------------------------------
class CACHETPallas:
    def __init__(self, key, num_channels, hidden_dim, feat_sz):
        self.hidden_dim = hidden_dim
        self.feat_sz_s = feat_sz
        self.feat_len_s = feat_sz * feat_sz
        k0, k1, k2, k3, k4 = jax.random.split(key, 5)
        # bottleneck Conv2d(num_channels, hidden_dim, kernel_size=1)
        self.bottleneck_w = (
            jax.random.normal(k0, (hidden_dim, num_channels), jnp.float32) * 0.02
        )
        self.bottleneck_b = jax.random.normal(k1, (hidden_dim,), jnp.float32) * 0.02
        # kernel-ready layouts, computed once (parameters are static)
        self._w_t = jnp.transpose(self.bottleneck_w)            # (Cin, Cout)
        self._b_row = self.bottleneck_b.reshape(1, hidden_dim)  # (1, Cout)
        # uncertain embeds (PyTorch inits them to zeros; use small deterministic
        # values here so the broadcast add is exercised non-trivially).
        self.search_uncertain_embed = (
            jax.random.normal(k2, (400, 1, hidden_dim), jnp.float32) * 0.02
        )
        self.gt_uncertain_embed = (
            jax.random.normal(k3, (64, 1, hidden_dim), jnp.float32) * 0.02
        )
        self.template_uncertain_embed = (
            jax.random.normal(k4, (64, 1, hidden_dim), jnp.float32) * 0.02
        )
        # concat + broadcast of the uncertain embeds hoisted off the forward
        # path: computed once per (L, B) configuration and cached.
        self._uemb_cache = {}

    # --- CACHET.adjust(): bottleneck + feat/pos flatten-permute (Pallas kernel 1) ---
    def adjust(self, src_feat, mask, pos_embed):
        return adjust_fused(src_feat, mask, pos_embed, self._w_t, self._b_row)

    def _uncertain_embed_2d(self, L, B):
        key = (L, B)
        if key not in self._uemb_cache:
            if L < 464 or (L - 464) % 64 != 0:
                raise ValueError(
                    f"pos length {L} incompatible with uncertain embeds "
                    f"(expected 464 + 64 * n_template)")
            n_template = (L - 400 - 64) // 64
            ue = jnp.concatenate(
                [self.gt_uncertain_embed]
                + [self.template_uncertain_embed] * n_template
                + [self.search_uncertain_embed],
                axis=0,
            )                                                    # (L, 1, C)
            ue = jnp.broadcast_to(ue, (L, B, self.hidden_dim))
            self._uemb_cache[key] = ue.reshape(L, B * self.hidden_dim)
        return self._uemb_cache[key]

    # --- CACHET.apply_uncertain_embed() (Pallas kernel 2) ---
    def apply_uncertain_embed(self, seq_dict):
        pos = seq_dict["pos"]
        L, B, C = pos.shape
        emb2d = self._uncertain_embed_2d(L, B)
        out2d = add_uncertain_embed_2d(pos.reshape(L, B * C), emb2d)
        ret = dict(seq_dict)
        ret["pos"] = out2d.reshape(L, B, C)
        return ret

    # --- CACHET.forward_head() cls branch reduction (Pallas kernel 3) ---
    def cls_token_pool(self, encode_embed):
        return mean_last_tokens(encode_embed, self.feat_len_s)


if __name__ == "__main__":
    key = jax.random.PRNGKey(0)
    k_feat, k_pos, k_enc, k_params, k_posb = jax.random.split(key, 5)

    # small shapes consistent with the module
    B, Cin, H, W = 2, 16, 8, 8          # backbone feature map (NCHW)
    hidden_dim = 32                      # transformer.d_model
    feat_sz = 20                         # box_head.feat_sz -> feat_len_s = 400
    n_template = 1
    L = 400 + 64 + n_template * 64       # 528 tokens: gt + template + search

    model = CACHETPallas(k_params, Cin, hidden_dim, feat_sz)

    # --- mode='backbone' path: adjust() on a synthetic backbone output ---
    src_feat = jax.random.normal(k_feat, (B, Cin, H, W), jnp.float32)
    mask = jnp.zeros((B, H, W), jnp.bool_)
    pos_backbone = jax.random.normal(k_posb, (B, hidden_dim, H, W), jnp.float32)
    seq_from_backbone = model.adjust(src_feat, mask, pos_backbone)

    # reference for the fused bottleneck 1x1 conv + permutes
    feat_ref = (
        jnp.einsum("bchw,oc->bohw", src_feat, model.bottleneck_w)
        + model.bottleneck_b[None, :, None, None]
    )
    feat_vec_ref = jnp.transpose(feat_ref.reshape(B, hidden_dim, H * W), (2, 0, 1))
    pos_vec_ref = jnp.transpose(pos_backbone.reshape(B, hidden_dim, H * W), (2, 0, 1))
    assert jnp.allclose(seq_from_backbone["feat"], feat_vec_ref, rtol=1e-4, atol=1e-4)
    assert jnp.allclose(seq_from_backbone["pos"], pos_vec_ref, rtol=1e-5, atol=1e-5)

    # --- mode='transformer' path: apply_uncertain_embed + head pooling ---
    pos = jax.random.normal(k_pos, (L, B, hidden_dim), jnp.float32)
    seq_dict = {"feat": jnp.zeros((L, B, hidden_dim), jnp.float32),
                "mask": jnp.zeros((B, L), jnp.bool_),
                "pos": pos}
    seq_dict2 = model.apply_uncertain_embed(seq_dict)

    uemb_ref = jnp.concatenate(
        [model.gt_uncertain_embed]
        + [model.template_uncertain_embed] * n_template
        + [model.search_uncertain_embed],
        axis=0,
    )
    assert jnp.allclose(seq_dict2["pos"], pos + uemb_ref, rtol=1e-5, atol=1e-5)

    # synthetic encoder output (the transformer itself is an external module)
    encode_embed = jax.random.normal(k_enc, (L, B, hidden_dim), jnp.float32)
    pooled = model.cls_token_pool(encode_embed)
    pooled_ref = jnp.mean(encode_embed[-model.feat_len_s:], axis=0)
    assert jnp.allclose(pooled, pooled_ref, rtol=1e-4, atol=1e-4)

    jax.block_until_ready((seq_from_backbone["feat"], seq_from_backbone["pos"],
                           seq_dict2["pos"], pooled))
    print("KERNEL_OK")
</pallas_src>

<mosaic_0001>
module attributes {stable_mosaic.version = 11 : i64} {
  func.func @_adjust_kernel(%arg0: memref<2x16x64xf32, #tpu.memory_space<vmem>>, %arg1: memref<16x32xf32, #tpu.memory_space<vmem>>, %arg2: memref<1x32xf32, #tpu.memory_space<vmem>>, %arg3: memref<2x32x64xf32, #tpu.memory_space<vmem>>, %arg4: memref<64x64xf32, #tpu.memory_space<vmem>>, %arg5: memref<64x64xf32, #tpu.memory_space<vmem>>) attributes {dimension_semantics = [], scalar_prefetch = 0 : i64, scratch_operands = 0 : i64, tpu.core_type = #tpu.core_type<tc>} {
    %c0 = arith.constant 0 : index
    %c0_0 = arith.constant 0 : index
    %0 = vector.load %arg1[%c0, %c0_0] : memref<16x32xf32, #tpu.memory_space<vmem>>, vector<16x32xf32>
    %c0_1 = arith.constant 0 : index
    %c0_2 = arith.constant 0 : index
    %1 = vector.load %arg2[%c0_1, %c0_2] : memref<1x32xf32, #tpu.memory_space<vmem>>, vector<1x32xf32>
    %2 = vector.shape_cast %1 : vector<1x32xf32> to vector<1x32xf32>
    %3 = vector.broadcast %2 : vector<1x32xf32> to vector<64x32xf32>
    %4 = tpu.iota {dimensions = array<i32: 0>} : vector<32x32xi32>
    %5 = tpu.iota {dimensions = array<i32: 1>} : vector<32x32xi32>
    %c0_i32 = arith.constant 0 : i32
    %6 = vector.broadcast %c0_i32 : i32 to vector<32x32xi32>
    %7 = arith.addi %4, %6 : vector<32x32xi32>
    %8 = arith.cmpi eq, %7, %5 : vector<32x32xi32>
    %9 = arith.extui %8 : vector<32x32xi1> to vector<32x32xi32>
    %10 = arith.sitofp %9 : vector<32x32xi32> to vector<32x32xf32>
    %c0_3 = arith.constant 0 : index
    %c0_4 = arith.constant 0 : index
    %c0_5 = arith.constant 0 : index
    %11 = vector.load %arg0[%c0_3, %c0_4, %c0_5] : memref<2x16x64xf32, #tpu.memory_space<vmem>>, vector<1x16x64xf32>
    %12 = vector.shape_cast %11 : vector<1x16x64xf32> to vector<16x64xf32>
    %cst = arith.constant dense<0.000000e+00> : vector<64x32xf32>
    %13 = tpu.matmul %12, %0, %cst {dimension_numbers = #tpu.dot_dimension_numbers<[0], [0], [1], [1], [0, 1, 1, 1], [], []>} : vector<16x64xf32>, vector<16x32xf32>, vector<64x32xf32> -> vector<64x32xf32>
    %14 = arith.addf %13, %3 : vector<64x32xf32>
    %c0_6 = arith.constant 0 : index
    %c0_7 = arith.constant 0 : index
    %15 = vector.load %arg4[%c0_6, %c0_7] : memref<64x64xf32, #tpu.memory_space<vmem>>, vector<64x32xf32>
    tpu.vector_store %arg4[%c0_6, %c0_7], %14 {strides = array<i32>} : memref<64x64xf32, #tpu.memory_space<vmem>>, vector<64x32xf32>,
    %c0_8 = arith.constant 0 : index
    %c0_9 = arith.constant 0 : index
    %c0_10 = arith.constant 0 : index
    %16 = vector.load %arg3[%c0_8, %c0_9, %c0_10] : memref<2x32x64xf32, #tpu.memory_space<vmem>>, vector<1x32x64xf32>
    %17 = vector.shape_cast %16 : vector<1x32x64xf32> to vector<32x64xf32>
    %cst_11 = arith.constant dense<0.000000e+00> : vector<64x32xf32>
    %18 = tpu.matmul %17, %10, %cst_11 {dimension_numbers = #tpu.dot_dimension_numbers<[0], [0], [1], [1], [0, 1, 1, 1], [], []>} : vector<32x64xf32>, vector<32x32xf32>, vector<64x32xf32> -> vector<64x32xf32>
    %c0_12 = arith.constant 0 : index
    %c0_13 = arith.constant 0 : index
    %19 = vector.load %arg5[%c0_12, %c0_13] : memref<64x64xf32, #tpu.memory_space<vmem>>, vector<64x32xf32>
    tpu.vector_store %arg5[%c0_12, %c0_13], %18 {strides = array<i32>} : memref<64x64xf32, #tpu.memory_space<vmem>>, vector<64x32xf32>,
    %c1 = arith.constant 1 : index
    %c0_14 = arith.constant 0 : index
    %c0_15 = arith.constant 0 : index
    %20 = vector.load %arg0[%c1, %c0_14, %c0_15] : memref<2x16x64xf32, #tpu.memory_space<vmem>>, vector<1x16x64xf32>
    %21 = vector.shape_cast %20 : vector<1x16x64xf32> to vector<16x64xf32>
    %cst_16 = arith.constant dense<0.000000e+00> : vector<64x32xf32>
    %22 = tpu.matmul %21, %0, %cst_16 {dimension_numbers = #tpu.dot_dimension_numbers<[0], [0], [1], [1], [0, 1, 1, 1], [], []>} : vector<16x64xf32>, vector<16x32xf32>, vector<64x32xf32> -> vector<64x32xf32>
    %23 = arith.addf %22, %3 : vector<64x32xf32>
    %c0_17 = arith.constant 0 : index
    %c32 = arith.constant 32 : index
    %24 = vector.load %arg4[%c0_17, %c32] : memref<64x64xf32, #tpu.memory_space<vmem>>, vector<64x32xf32>
    tpu.vector_store %arg4[%c0_17, %c32], %23 {strides = array<i32>} : memref<64x64xf32, #tpu.memory_space<vmem>>, vector<64x32xf32>,
    %c1_18 = arith.constant 1 : index
    %c0_19 = arith.constant 0 : index
    %c0_20 = arith.constant 0 : index
    %25 = vector.load %arg3[%c1_18, %c0_19, %c0_20] : memref<2x32x64xf32, #tpu.memory_space<vmem>>, vector<1x32x64xf32>
    %26 = vector.shape_cast %25 : vector<1x32x64xf32> to vector<32x64xf32>
    %cst_21 = arith.constant dense<0.000000e+00> : vector<64x32xf32>
    %27 = tpu.matmul %26, %10, %cst_21 {dimension_numbers = #tpu.dot_dimension_numbers<[0], [0], [1], [1], [0, 1, 1, 1], [], []>} : vector<32x64xf32>, vector<32x32xf32>, vector<64x32xf32> -> vector<64x32xf32>
    %c0_22 = arith.constant 0 : index
    %c32_23 = arith.constant 32 : index
    %28 = vector.load %arg5[%c0_22, %c32_23] : memref<64x64xf32, #tpu.memory_space<vmem>>, vector<64x32xf32>
    tpu.vector_store %arg5[%c0_22, %c32_23], %27 {strides = array<i32>} : memref<64x64xf32, #tpu.memory_space<vmem>>, vector<64x32xf32>,
    return
  }
}

</mosaic_0001>

<bundles_post_ra>
// kernel: tpu_custom_call.1
= control target key start
LH: loop header
LB: loop body
LE: loop exit
PB: predicated region body
PF: predicated region fallthrough
CT: control target
= control target key end

     0   :  { %11 = vsyncpa [#allocation3], 0  ;;  %s1378_s0 = inlined_call_operand.hbm [shape: f32[2,16,64], index: 0, kind: input, shape index: {}]   ;;  %s1379_s1 = inlined_call_operand.hbm [shape: f32[16,32], index: 1, kind: input, shape index: {}]   ;;  %s1380_s2 = inlined_call_operand.vmem [shape: f32[1,32], index: 2, kind: input, shape index: {}]   ;;  %s1381_s3 = inlined_call_operand.hbm [shape: f32[2,32,64], index: 3, kind: input, shape index: {}]   ;;  %s1382_s4 = inlined_call_operand.hbm [shape: f32[64,64], index: 4, kind: output, shape index: {0}]   ;;  %s1383_s5 = inlined_call_operand.hbm [shape: f32[64,64], index: 5, kind: output, shape index: {1}]  }
   0x1   :  { %12 = vsyncpa [#allocation6], 0 }
   0x2   :  { %13 = vsyncpa [#allocation4], 0 }
   0x3   :  { %14 = vsyncpa [#allocation10], 0  ;;  %s1160_s18 = smov [#allocation5]   ;;  %s1161_s20 = smov [#allocation2]  }
   0x4   :  { %s32_s19 = sshll.u32 %s1160_s18, 4  ;;  %s20_s21 = sshll.u32 %s1161_s20, 4  ;;  %s33_s19 = int_to_ptr.vmem [resolvable:$true] %s32_s19  ;;  %s21_s21 = int_to_ptr.vmem [resolvable:$true] %s20_s21 }
   0x5   :  { %s1060_s22 = scalar_lea.vmem %s33_s19, 256  ;;  %p1065_p1 = scmp.lt.s32.totalorder %s33_s19, %s33_s19 }
   0x6   :  { %p1061_p0 = scmp.ne.s32.totalorder %s33_s19, %s1060_s22  ;;  %p1066_p2 = scmp.lt.s32.totalorder %s1060_s22, %s1060_s22 }
   0x8   :  { %p1067_p3 = por %p1066_p2, %p1065_p1 }
   0xa   :  { %p1068_p4 = pnand %p1067_p3, %p1061_p0 }
   0xc   :  { %1071 = shalt.err (!%p1068_p4)
}
   0xd   :  { %s1162_s23 = smov 128   ;;  %s1163_s24 = smov 8  }
   0xe   :  { %38 = dma.hbm_to_vmem [thread:$0]  %s1379_s1, 256, %s33_s19, [#allocation6], %s1162_s23, %s1162_s23, %s1163_s24  }
   0xf   :  { %s1080_s27 = scalar_lea.vmem %s21_s21, 512  ;;  %p1085_p6 = scmp.lt.s32.totalorder %s21_s21, %s21_s21 }
  0x10   :  { %p1081_p5 = scmp.ne.s32.totalorder %s21_s21, %s1080_s27  ;;  %p1086_p7 = scmp.lt.s32.totalorder %s1080_s27, %s1080_s27 }
  0x12   :  { %p1087_p8 = por %p1086_p7, %p1085_p6 }
  0x14   :  { %p1088_p9 = pnand %p1087_p8, %p1081_p5 }
  0x16   :  { %1091 = shalt.err (!%p1088_p9)
}
  0x17   :  { %26 = dma.hbm_to_vmem [thread:$0]  %s1378_s0, 512, %s21_s21, [#allocation3], %s1162_s23, %s1162_s23, %s1163_s24  }
  0x18   :  { %s1164_s30 = smov [#allocation7]  }
  0x19   :  { %s46_s6 = sshll.u32 %s1164_s30, 4  ;;  %s47_s6 = int_to_ptr.vmem [resolvable:$true] %s46_s6 }
  0x1a   :  { %s1100_s7 = scalar_lea.vmem %s47_s6, 1024  ;;  %p1105_p11 = scmp.lt.s32.totalorder %s47_s6, %s47_s6 }
  0x1b   :  { %p1101_p10 = scmp.ne.s32.totalorder %s47_s6, %s1100_s7  ;;  %p1106_p12 = scmp.lt.s32.totalorder %s1100_s7, %s1100_s7 }
  0x1d   :  { %p1107_p13 = por %p1106_p12, %p1105_p11 }
  0x1f   :  { %p1108_p0 = pnand %p1107_p13, %p1101_p10 }
  0x21   :  { %1111 = shalt.err (!%p1108_p0)
}
  0x22   :  { %52 = dma.hbm_to_vmem [thread:$0]  %s1381_s3, 1024, %s47_s6, [#allocation6], %s1162_s23, %s1162_s23, %s1163_s24  }
  0x23   :  { %1152 = dma.done.wait [#allocation3], 512  }
  0x24   :  { %1153 = vsyncadd [#allocation3], 4294966784 }
  0x25   :  { %1154 = dma.done.wait [#allocation6], 1280  }
  0x26   :  { %1155 = vsyncadd [#allocation6], 4294966016  ;;  %v71_v0 = vlaneseq  ;;  %v90_v2 = vld [vmem:[#allocation2] sm:$0xff]  ;;  %v263_v3 = vld [vmem:[#allocation7] sm:$0xff]  ;;  %v1165_v13 = vmov 1.0   ;;  %vm124_vm4 = vcmask 130048  }
  0x27   :  { %92 = vxpose.xlu0.b32.start [1/2] (short) (narrow) %v90_v2, 64  ;;  %267 = vxpose.xlu1.b32.start [1/4] (short) (narrow) %v263_v3, 64  ;;  %v91_v5 = vld [vmem:[#allocation2 + $0x8] sm:$0xff]  ;;  %v264_v6 = vld [vmem:[#allocation7 + $0x8] sm:$0xff]  ;;  %v62_v10 = vld [vmem:[#allocation5] sm:$0xff]  ;;  %vm254_vm5 = vcmask 261120  }
  0x28   :  { %v1217_v1 = vshrl.u32 %v71_v0, 7  ;;  %v1220_v7 = vand.u32 127, %v71_v0  ;;  %v63_v9 = vld [vmem:[#allocation5 + $0x8] sm:$0xff]  ;;  %v265_v12 = vld [vmem:[#allocation7 + $0x10] sm:$0xff]  ;;  %v437_v15 = vld [vmem:[#allocation2 + $0x10] sm:$0xff]  ;;  %vm632_vm6 = vcmask 523520  }
  0x29   :  { %970 = vmatprep.subr.mxu0 %v63_v9  ;;  %v266_v14 = vld [vmem:[#allocation7 + $0x18] sm:$0xff]  ;;  %v642_v16 = vld [vmem:[#allocation7 + $0x20] sm:$0xff]  ;;  %v438_v17 = vld [vmem:[#allocation2 + $0x18] sm:$0xff]  ;;  %s1167_s9 = smov [#allocation8]  }
  0x2a   :  { %v75_v4 = vadd.s32 24, %v1217_v1  ;;  %v74_v8 = vadd.s32 16, %v1217_v1  ;;  %v73_v11 = vadd.s32 8, %v1217_v1  ;;  %971 = vmatpush3.msra.mxu0 %v63_v9  ;;  %vm78_vm3 = vcmp.eq.s32.totalorder %v1217_v1, %v1220_v7  ;;  %v643_v18 = vld [vmem:[#allocation7 + $0x28] sm:$0xff]  ;;  %v644_v19 = vld [vmem:[#allocation7 + $0x30] sm:$0xff]  ;;  %v645_v20 = vld [vmem:[#allocation7 + $0x38] sm:$0xff] }
  0x2b   :  { %93 = vxpose.xlu0.b32.end [2/2] (short) (narrow) %v91_v5, 64  ;;  %268 = vxpose.xlu1.b32.cont [2/4] (short) (narrow) %v264_v6, 64  ;;  %v1300_v53 = vld [vmem:[%s1380_s2] ss:$0 sm:$0xff]  ;;  %s1166_s2 = smov 32   ;;  %s852_s10 = sshll.u32 %s1167_s9, 4  ;;  %s853_s10 = int_to_ptr.vmem [resolvable:$true] %s852_s10 }
  0x2c   :  { %vm81_vm0 = vcmp.eq.s32.totalorder %v75_v4, %v1220_v7  ;;  %vm80_vm1 = vcmp.eq.s32.totalorder %v74_v8, %v1220_v7  ;;  %972 = vmatprep.subr.mxu0 %v62_v10  ;;  %vm79_vm2 = vcmp.eq.s32.totalorder %v73_v11, %v1220_v7  ;;  %s1112_s11 = scalar_lea.vmem %s853_s10, 1024  ;;  %p1117_p2 = scmp.lt.s32.totalorder %s853_s10, %s853_s10 }
  0x2d   :  { %986 = vmatprep.subr.msk.mxu1 %vm81_vm0, %v1165_v13  ;;  %973 = vmatpush3.msra.mxu0 %v62_v10  ;;  %p1113_p1 = scmp.ne.s32.totalorder %s853_s10, %s1112_s11  ;;  %p1118_p3 = scmp.lt.s32.totalorder %s1112_s11, %s1112_s11 }
  0x2e   :  { %987 = vmatpush3.msk.msra.mxu1 %vm81_vm0, %v1165_v13  ;;  %1006 = vmatprep.subr.mxu0 %v63_v9 }
  0x2f   :  { %988 = vmatprep.subr.msk.mxu1 %vm80_vm1, %v1165_v13  ;;  %269 = vxpose.xlu1.b32.cont [3/4] (short) (narrow) %v265_v12, 64  ;;  %p1119_p4 = por %p1118_p3, %p1117_p2 }
  0x30   :  { %989 = vmatpush3.msk.msra.mxu1 %vm80_vm1, %v1165_v13 }
  0x31   :  { %990 = vmatprep.subr.msk.mxu1 %vm79_vm2, %v1165_v13  ;;  %p1120_p5 = pnand %p1119_p4, %p1113_p1 }
  0x32   :  { %991 = vmatpush3.msk.msra.mxu1 %vm79_vm2, %v1165_v13 }
  0x33   :  { %270 = vxpose.xlu1.b32.end [4/4] (short) (narrow) %v266_v14, 64  ;;  %992 = vmatprep.subr.msk.mxu1 %vm78_vm3, %v1165_v13 }
  0x34   :  { %993 = vmatpush3.msk.msra.mxu1 %vm78_vm3, %v1165_v13 }
  0x35   :  { %1022 = vmatprep.subr.msk.mxu1 %vm81_vm0, %v1165_v13 }
  0x44   :  { %439 = vxpose.xlu0.b32.start [1/2] (short) (narrow) %v437_v15, 64  ;;  %646 = vxpose.xlu1.b32.start [1/4] (short) (narrow) %v642_v16, 64 }
  0x48   :  { %440 = vxpose.xlu0.b32.end [2/2] (short) (narrow) %v438_v17, 64  ;;  %647 = vxpose.xlu1.b32.cont [2/4] (short) (narrow) %v643_v18, 64 }
  0x4c   :  { %648 = vxpose.xlu1.b32.cont [3/4] (short) (narrow) %v644_v19, 64 }
  0x50   :  { %649 = vxpose.xlu1.b32.end [4/4] (short) (narrow) %v645_v20, 64 }
  0xa3   :  { %v108_v21 = vpop.trf.xlu0  ;;  %v283_v22 = vpop.trf.xlu1 }
  0xa4   :  { %974 = vmatprep.mubr.msk.f32.mxu0 %vm124_vm4, %v108_v21  ;;  %994 = vmatprep.mubr.msk.f32.mxu1 %vm254_vm5, %v283_v22 }
  0xa7   :  { %v109_v23 = vpop.trf.xlu0  ;;  %v284_v24 = vpop.trf.xlu1 }
  0xa8   :  { %975 = vmatmul.mubr.msk.f32.vlgmr.msra.gmra.mxu0 %vm124_vm4, %v109_v23  ;;  %995 = vmatmul.mubr.msk.f32.vlgmr.msra.gmra.mxu1 %vm254_vm5, %v284_v24 }
  0xa9   :  { %1007 = vmatpush3.msra.mxu0 %v63_v9  ;;  %1023 = vmatpush3.msk.msra.mxu1 %vm81_vm0, %v1165_v13 }
  0xaa   :  { %1008 = vmatprep.subr.mxu0 %v62_v10  ;;  %1024 = vmatprep.subr.msk.mxu1 %vm80_vm1, %v1165_v13 }
  0xab   :  { %v110_v25 = vpop.trf.xlu0  ;;  %v285_v26 = vpop.trf.xlu1  ;;  %1009 = vmatpush3.msra.mxu0 %v62_v10  ;;  %1025 = vmatpush3.msk.msra.mxu1 %vm80_vm1, %v1165_v13 }
  0xac   :  { %977 = vmatprep.mubr.msk.f32.mxu0 %vm124_vm4, %v110_v25  ;;  %997 = vmatprep.mubr.msk.f32.mxu1 %vm254_vm5, %v285_v26 }
  0xad   :  { %1026 = vmatprep.subr.msk.mxu1 %vm79_vm2, %v1165_v13 }
  0xae   :  { %1027 = vmatpush3.msk.msra.mxu1 %vm79_vm2, %v1165_v13 }
  0xaf   :  { %v111_v27 = vpop.trf.xlu0  ;;  %v286_v28 = vpop.trf.xlu1  ;;  %1028 = vmatprep.subr.msk.mxu1 %vm78_vm3, %v1165_v13 }
  0xb0   :  { %978 = vmatmul.mubr.msk.f32.gmra.mxu0 %vm124_vm4, %v111_v27  ;;  %998 = vmatmul.mubr.msk.f32.gmra.mxu1 %vm254_vm5, %v286_v28 }
  0xb1   :  { %1029 = vmatpush3.msk.msra.mxu1 %vm78_vm3, %v1165_v13 }
  0xb3   :  { %v112_v29 = vpop.trf.xlu0  ;;  %v287_v30 = vpop.trf.xlu1 }
  0xb4   :  { %980 = vmatprep.mubr.msk.f32.mxu0 %vm124_vm4, %v112_v29  ;;  %1000 = vmatprep.mubr.msk.f32.mxu1 %vm254_vm5, %v287_v30 }
  0xb7   :  { %v113_v31 = vpop.trf.xlu0  ;;  %v288_v32 = vpop.trf.xlu1 }
  0xb8   :  { %981 = vmatmul.mubr.msk.f32.gmra.mxu0 %vm124_vm4, %v113_v31  ;;  %1001 = vmatmul.mubr.msk.f32.gmra.mxu1 %vm254_vm5, %v288_v32 }
  0xbb   :  { %v114_v33 = vpop.trf.xlu0  ;;  %v289_v34 = vpop.trf.xlu1 }
  0xbc   :  { %983 = vmatprep.mubr.msk.f32.mxu0 %vm124_vm4, %v114_v33  ;;  %1003 = vmatprep.mubr.msk.f32.mxu1 %vm254_vm5, %v289_v34 }
  0xbf   :  { %v115_v35 = vpop.trf.xlu0  ;;  %v290_v36 = vpop.trf.xlu1 }
  0xc0   :  { %984 = vmatmul.mubr.msk.f32.gmra.mxu0 %vm124_vm4, %v115_v35  ;;  %1004 = vmatmul.mubr.msk.f32.gmra.mxu1 %vm254_vm5, %v290_v36 }
  0xc3   :  { %v455_v37 = vpop.trf.xlu0  ;;  %v662_v38 = vpop.trf.xlu1 }
  0xc4   :  { %1010 = vmatprep.mubr.msk.f32.mxu0 %vm124_vm4, %v455_v37  ;;  %1030 = vmatprep.mubr.msk.f32.mxu1 %vm254_vm5, %v662_v38 }
  0xc7   :  { %v456_v39 = vpop.trf.xlu0  ;;  %v663_v40 = vpop.trf.xlu1 }
  0xc8   :  { %1011 = vmatmul.mubr.msk.f32.vlgmr.msra.gmra.mxu0 %vm124_vm4, %v456_v39  ;;  %1031 = vmatmul.mubr.msk.f32.vlgmr.msra.gmra.mxu1 %vm254_vm5, %v663_v40 }
  0xcb   :  { %v457_v41 = vpop.trf.xlu0  ;;  %v664_v42 = vpop.trf.xlu1 }
  0xcc   :  { %1013 = vmatprep.mubr.msk.f32.mxu0 %vm124_vm4, %v457_v41  ;;  %1033 = vmatprep.mubr.msk.f32.mxu1 %vm254_vm5, %v664_v42 }
  0xcf   :  { %v458_v43 = vpop.trf.xlu0  ;;  %v665_v44 = vpop.trf.xlu1 }
  0xd0   :  { %1014 = vmatmul.mubr.msk.f32.gmra.mxu0 %vm124_vm4, %v458_v43  ;;  %1034 = vmatmul.mubr.msk.f32.gmra.mxu1 %vm254_vm5, %v665_v44 }
  0xd3   :  { %v459_v45 = vpop.trf.xlu0  ;;  %v666_v46 = vpop.trf.xlu1 }
  0xd4   :  { %1016 = vmatprep.mubr.msk.f32.mxu0 %vm124_vm4, %v459_v45  ;;  %1036 = vmatprep.mubr.msk.f32.mxu1 %vm254_vm5, %v666_v46 }
  0xd7   :  { %v460_v47 = vpop.trf.xlu0  ;;  %v667_v48 = vpop.trf.xlu1 }
  0xd8   :  { %1017 = vmatmul.mubr.msk.f32.gmra.mxu0 %vm124_vm4, %v460_v47  ;;  %1037 = vmatmul.mubr.msk.f32.gmra.mxu1 %vm254_vm5, %v667_v48 }
  0xdb   :  { %v461_v49 = vpop.trf.xlu0  ;;  %v668_v50 = vpop.trf.xlu1 }
  0xdc   :  { %1019 = vmatprep.mubr.msk.f32.mxu0 %vm124_vm4, %v461_v49  ;;  %1039 = vmatprep.mubr.msk.f32.mxu1 %vm254_vm5, %v668_v50 }
  0xdf   :  { %v462_v51 = vpop.trf.xlu0  ;;  %v669_v52 = vpop.trf.xlu1 }
  0xe0   :  { %1020 = vmatmul.mubr.msk.f32.gmra.mxu0 %vm124_vm4, %v462_v51  ;;  %1040 = vmatmul.mubr.msk.f32.gmra.mxu1 %vm254_vm5, %v669_v52 }
 0x168   :  { %v976_v54 = vpop.f32.mrf.mxu0  ;;  %v996_v55 = vpop.f32.mrf.mxu1 }
 0x169   :  { %v221_v56 = vadd.f32 %v976_v54, %v1300_v53  ;;  %429 = vst.msk [vmem:[#allocation9 + $0x8] sm:$0xff] %vm254_vm5, %v996_v55 }
 0x16a   :  { %v215_v57 = vpop.f32.mrf.mxu0  ;;  %v389_v58 = vpop.f32.mrf.mxu1 }
 0x16b   :  { %256 = vst.msk [vmem:[#allocation8 + $0x8] sm:$0xff] %vm254_vm5, %v221_v56  ;;  %v216_v59 = vadd.f32 %v1300_v53, %v215_v57  ;;  %428 = vst.msk [vmem:[#allocation9] sm:$0xff] %vm254_vm5, %v389_v58 }
 0x16d   :  { %255 = vst.msk [vmem:[#allocation8] sm:$0xff] %vm254_vm5, %v216_v59 }
 0x170   :  { %v979_v60 = vpop.f32.mrf.mxu0  ;;  %v999_v61 = vpop.f32.mrf.mxu1 }
 0x171   :  { %v231_v62 = vadd.f32 %v979_v60, %v1300_v53  ;;  %431 = vst.msk [vmem:[#allocation9 + $0x18] sm:$0xff] %vm254_vm5, %v999_v61 }
 0x172   :  { %v225_v63 = vpop.f32.mrf.mxu0  ;;  %v399_v0 = vpop.f32.mrf.mxu1 }
 0x173   :  { %258 = vst.msk [vmem:[#allocation8 + $0x18] sm:$0xff] %vm254_vm5, %v231_v62  ;;  %v226_v1 = vadd.f32 %v1300_v53, %v225_v63  ;;  %430 = vst.msk [vmem:[#allocation9 + $0x10] sm:$0xff] %vm254_vm5, %v399_v0 }
 0x175   :  { %257 = vst.msk [vmem:[#allocation8 + $0x10] sm:$0xff] %vm254_vm5, %v226_v1 }
 0x178   :  { %v982_v2 = vpop.f32.mrf.mxu0  ;;  %v1002_v3 = vpop.f32.mrf.mxu1 }
 0x179   :  { %v241_v4 = vadd.f32 %v982_v2, %v1300_v53  ;;  %433 = vst.msk [vmem:[#allocation9 + $0x28] sm:$0xff] %vm254_vm5, %v1002_v3 }
 0x17a   :  { %v235_v5 = vpop.f32.mrf.mxu0  ;;  %v409_v6 = vpop.f32.mrf.mxu1 }
 0x17b   :  { %260 = vst.msk [vmem:[#allocation8 + $0x28] sm:$0xff] %vm254_vm5, %v241_v4  ;;  %v236_v7 = vadd.f32 %v1300_v53, %v235_v5  ;;  %432 = vst.msk [vmem:[#allocation9 + $0x20] sm:$0xff] %vm254_vm5, %v409_v6 }
 0x17d   :  { %259 = vst.msk [vmem:[#allocation8 + $0x20] sm:$0xff] %vm254_vm5, %v236_v7 }
 0x180   :  { %v985_v8 = vpop.f32.mrf.mxu0  ;;  %v1005_v9 = vpop.f32.mrf.mxu1 }
 0x181   :  { %v251_v10 = vadd.f32 %v985_v8, %v1300_v53  ;;  %435 = vst.msk [vmem:[#allocation9 + $0x38] sm:$0xff] %vm254_vm5, %v1005_v9 }
 0x182   :  { %v245_v11 = vpop.f32.mrf.mxu0  ;;  %v419_v12 = vpop.f32.mrf.mxu1 }
 0x183   :  { %262 = vst.msk [vmem:[#allocation8 + $0x38] sm:$0xff] %vm254_vm5, %v251_v10  ;;  %v246_v13 = vadd.f32 %v1300_v53, %v245_v11  ;;  %434 = vst.msk [vmem:[#allocation9 + $0x30] sm:$0xff] %vm254_vm5, %v419_v12 }
 0x185   :  { %261 = vst.msk [vmem:[#allocation8 + $0x30] sm:$0xff] %vm254_vm5, %v246_v13 }
 0x188   :  { %v1012_v14 = vpop.f32.mrf.mxu0  ;;  %v1032_v19 = vpop.f32.mrf.mxu1 }
 0x189   :  { %v567_v15 = vadd.f32 %v1012_v14, %v1300_v53 }
 0x18a   :  { %v561_v16 = vpop.f32.mrf.mxu0  ;;  %v768_v25 = vpop.f32.mrf.mxu1 }
 0x18b   :  { %v562_v17 = vadd.f32 %v1300_v53, %v561_v16  ;;  %610 = vrot.lane.b32.xlu1 %v567_v15, %s1166_s2 }
 0x18d   :  { %608 = vrot.lane.b32.xlu0 %v562_v17, %s1166_s2 }
 0x190   :  { %v1015_v18 = vpop.f32.mrf.mxu0  ;;  %v1035_v28 = vpop.f32.mrf.mxu1 }
 0x191   :  { %v577_v20 = vadd.f32 %v1015_v18, %v1300_v53  ;;  %817 = vrot.lane.b32.xlu0 %v1032_v19, %s1166_s2 }
 0x192   :  { %v571_v21 = vpop.f32.mrf.mxu0  ;;  %v778_v31 = vpop.f32.mrf.mxu1 }
 0x193   :  { %614 = vrot.lane.b32.xlu1 %v577_v20, %s1166_s2  ;;  %v572_v22 = vadd.f32 %v1300_v53, %v571_v21 }
 0x197   :  { %612 = vrot.lane.b32.xlu1 %v572_v22, %s1166_s2 }
 0x198   :  { %v1018_v23 = vpop.f32.mrf.mxu0  ;;  %v1038_v33 = vpop.f32.mrf.mxu1 }
 0x199   :  { %v587_v24 = vadd.f32 %v1018_v23, %v1300_v53 }
 0x19a   :  { %v581_v26 = vpop.f32.mrf.mxu0  ;;  %v788_v35 = vpop.f32.mrf.mxu1 }
 0x19b   :  { %815 = vrot.lane.b32.xlu1 %v768_v25, %s1166_s2  ;;  %618 = vrot.lane.b32.xlu0 %v587_v24, %s1166_s2  ;;  %v582_v27 = vadd.f32 %v1300_v53, %v581_v26 }
 0x19f   :  { %616 = vrot.lane.b32.xlu1 %v582_v27, %s1166_s2  ;;  %821 = vrot.lane.b32.xlu0 %v1035_v28, %s1166_s2 }
 0x1a0   :  { %v1021_v29 = vpop.f32.mrf.mxu0  ;;  %v1041_v36 = vpop.f32.mrf.mxu1 }
 0x1a1   :  { %v597_v30 = vadd.f32 %v1021_v29, %v1300_v53 }
 0x1a2   :  { %v591_v32 = vpop.f32.mrf.mxu0  ;;  %v798_v37 = vpop.f32.mrf.mxu1 }
 0x1a3   :  { %819 = vrot.lane.b32.xlu1 %v778_v31, %s1166_s2  ;;  %622 = vrot.lane.b32.xlu0 %v597_v30, %s1166_s2  ;;  %v592_v34 = vadd.f32 %v1300_v53, %v591_v32 }
 0x1a7   :  { %620 = vrot.lane.b32.xlu1 %v592_v34, %s1166_s2  ;;  %825 = vrot.lane.b32.xlu0 %v1038_v33, %s1166_s2 }
 0x1ab   :  { %823 = vrot.lane.b32.xlu1 %v788_v35, %s1166_s2  ;;  %829 = vrot.lane.b32.xlu0 %v1041_v36, %s1166_s2 }
 0x1af   :  { %827 = vrot.lane.b32.xlu1 %v798_v37, %s1166_s2 }
 0x1fd   :  { %v611_v38 = vpop.permute.xlu1 %610 }
 0x1fe   :  { %634 = vst.msk [vmem:[#allocation8 + $0x8] sm:$0xff] %vm632_vm6, %v611_v38 }
 0x1ff   :  { %v609_v39 = vpop.permute.xlu0 %608 }
 0x200   :  { %633 = vst.msk [vmem:[#allocation8] sm:$0xff] %vm632_vm6, %v609_v39 }
 0x203   :  { %v818_v40 = vpop.permute.xlu0 %817 }
 0x204   :  { %840 = vst.msk [vmem:[#allocation9 + $0x8] sm:$0xff] %vm632_vm6, %v818_v40 }
 0x205   :  { %v615_v41 = vpop.permute.xlu1 %614 }
 0x206   :  { %636 = vst.msk [vmem:[#allocation8 + $0x18] sm:$0xff] %vm632_vm6, %v615_v41 }
 0x209   :  { %v613_v42 = vpop.permute.xlu1 %612 }
 0x20a   :  { %635 = vst.msk [vmem:[#allocation8 + $0x10] sm:$0xff] %vm632_vm6, %v613_v42 }
 0x20d   :  { %v816_v43 = vpop.permute.xlu1 %815  ;;  %v619_v44 = vpop.permute.xlu0 %618 }
 0x20e   :  { %839 = vst.msk [vmem:[#allocation9] sm:$0xff] %vm632_vm6, %v816_v43  ;;  %638 = vst.msk [vmem:[#allocation8 + $0x28] sm:$0xff] %vm632_vm6, %v619_v44 }
 0x211   :  { %v617_v45 = vpop.permute.xlu1 %616  ;;  %v822_v46 = vpop.permute.xlu0 %821 }
 0x212   :  { %637 = vst.msk [vmem:[#allocation8 + $0x20] sm:$0xff] %vm632_vm6, %v617_v45  ;;  %842 = vst.msk [vmem:[#allocation9 + $0x18] sm:$0xff] %vm632_vm6, %v822_v46 }
 0x215   :  { %v820_v47 = vpop.permute.xlu1 %819  ;;  %v623_v48 = vpop.permute.xlu0 %622 }
 0x216   :  { %841 = vst.msk [vmem:[#allocation9 + $0x10] sm:$0xff] %vm632_vm6, %v820_v47  ;;  %640 = vst.msk [vmem:[#allocation8 + $0x38] sm:$0xff] %vm632_vm6, %v623_v48 }
 0x219   :  { %v621_v49 = vpop.permute.xlu1 %620  ;;  %v826_v50 = vpop.permute.xlu0 %825 }
 0x21a   :  { %639 = vst.msk [vmem:[#allocation8 + $0x30] sm:$0xff] %vm632_vm6, %v621_v49  ;;  %844 = vst.msk [vmem:[#allocation9 + $0x28] sm:$0xff] %vm632_vm6, %v826_v50 }
 0x21b   :  { %1123 = shalt.err (!%p1120_p5)
}
 0x21c   :  { %858 = dma.vmem_to_hbm [thread:$0]  %s853_s10, 1024, %s1382_s4, [#allocation4], %s1162_s23, %s1162_s23, %s1163_s24  }
 0x21d   :  { %v824_v51 = vpop.permute.xlu1 %823  ;;  %v830_v52 = vpop.permute.xlu0 %829  ;;  %s1168_s14 = smov [#allocation9]  }
 0x21e   :  { %s864_s15 = sshll.u32 %s1168_s14, 4  ;;  %843 = vst.msk [vmem:[#allocation9 + $0x20] sm:$0xff] %vm632_vm6, %v824_v51  ;;  %846 = vst.msk [vmem:[#allocation9 + $0x38] sm:$0xff] %vm632_vm6, %v830_v52  ;;  %s865_s15 = int_to_ptr.vmem [resolvable:$true] %s864_s15 }
 0x21f   :  { %s1132_s16 = scalar_lea.vmem %s865_s15, 1024  ;;  %p1137_p7 = scmp.lt.s32.totalorder %s865_s15, %s865_s15 }
 0x220   :  { %p1133_p6 = scmp.ne.s32.totalorder %s865_s15, %s1132_s16  ;;  %p1138_p8 = scmp.lt.s32.totalorder %s1132_s16, %s1132_s16 }
 0x221   :  { %v828_v53 = vpop.permute.xlu1 %827 }
 0x222   :  { %845 = vst.msk [vmem:[#allocation9 + $0x30] sm:$0xff] %vm632_vm6, %v828_v53  ;;  %p1139_p9 = por %p1138_p8, %p1137_p7 }
 0x224   :  { %p1140_p10 = pnand %p1139_p9, %p1133_p6 }
 0x226   :  { %1143 = shalt.err (!%p1140_p10)
}
 0x227   :  { %870 = dma.vmem_to_hbm [thread:$0]  %s865_s15, 1024, %s1383_s5, [#allocation10], %s1162_s23, %s1162_s23, %s1163_s24  }
 0x228   :  { %1156 = dma.done.wait [#allocation4], 1024  }
 0x229   :  { %1157 = vsyncadd [#allocation4], 4294966272 }
 0x22a   :  { %1158 = dma.done.wait [#allocation10], 1024  }
 0x22b   :  { %1159 = vsyncadd [#allocation10], 4294966272 }
 0x22c   :  { %877 = vsyncpa [#allocation3], 1 }
 0x22d   :  { %878 = vsyncpa [#allocation6], 1 }
 0x22e   :  { %879 = vsyncpa [#allocation4], 1 }
 0x22f   :  { %880 = vsyncpa [#allocation10], 1 }

</bundles_post_ra>
